<compile_context>
chip_gen: v7x
topology: tpu7x:2x2x1
jax: 0.10.0
libtpu: 0.0.40
codegen_flags: <defaults>
</compile_context>

<pallas_src>
import jax
import jax.numpy as jnp
from jax.experimental import pallas as pl
from jax.experimental.pallas import tpu as pltpu


def _tpu_vmem_bytes():
    """Per-TensorCore VMEM capacity, generation aware, with safe fallbacks."""
    try:
        return int(pltpu.get_tpu_info().vmem_capacity_bytes)
    except Exception:
        pass
    try:
        kind = jax.devices()[0].device_kind.lower()
        if "v7" in kind:
            return 64 << 20          # v7x: 64 MiB per TensorCore
        return 128 << 20             # v4 / v5e / v5p / v6e: 128 MiB
    except Exception:
        return 64 << 20              # most restrictive fallback


def _plan(nc, s, itemsize, max_block_bytes=None):
    """Pick (tm, tk, grid split, vmem_limit) from the VMEM budget."""
    vmem = _tpu_vmem_bytes()
    sub = max(8, 32 // max(itemsize, 1))      # sublane tile for the dtype

    # Row block: full NC when small; otherwise 64-row blocks (a multiple of
    # every dtype's sublane tile).  tm <= 64 keeps the three (tm, 128) f32
    # vreg-carry accumulators (3 * tm/8 vregs) well inside the 64-vreg file.
    tm = nc if nc <= 64 else 64
    tm_pad = ((tm + sub - 1) // sub) * sub
    num_r = (nc + tm - 1) // tm

    # Spatial tile: as fat as the double-buffered input blocks allow.  Target
    # multi-MiB blocks (review: the old 8192 cap is removed) while keeping
    # 2 inputs x 2 pipeline buffers within ~half of VMEM.
    s_cols = ((s + 127) // 128) * 128
    target = (8 << 20) if vmem >= (96 << 20) else (4 << 20)
    target = min(target, vmem // 8)
    if max_block_bytes is not None:
        target = min(target, max_block_bytes)
    tk = (target // (tm_pad * itemsize)) // 128 * 128
    tk = max(128, min(tk, s_cols))

    n_chunks = (s + tk - 1) // tk              # chunks that contain data
    n_full_chunks = s // tk                    # fully in-bounds chunks

    # Give a 2-TensorCore chip (v7x) >= 2 blocks on the parallel axes even
    # when there is a single row block.  Only split when the (at most one)
    # padding chunk it may introduce is free (even chunk count) or negligible.
    if num_r == 1 and n_chunks >= 2 and (n_chunks % 2 == 0 or n_chunks >= 16):
        n_split = 2
    else:
        n_split = 1
    num_k = (n_chunks + n_split - 1) // n_split

    buf_bytes = 4 * tm_pad * tk * itemsize     # 2 inputs x 2 pipeline buffers
    scratch_bytes = 3 * tm_pad * 128 * 4
    needed = buf_bytes + scratch_bytes + (1 << 20)
    vmem_limit = max(needed + (4 << 20), 32 << 20)
    vmem_limit = min(vmem_limit, int(vmem * 0.95))
    vmem_limit = max(vmem_limit, needed)
    return tm, tk, num_r, n_split, num_k, n_chunks, n_full_chunks, vmem_limit


def _make_dice_kernel(s_total, tm, tk, num_k, n_full_chunks, emit_full, emit_masked):
    """Kernel over grid (row_blocks, spatial_splits, spatial_chunks)."""
    n_sub = tk // 128
    unroll = max(1, min(n_sub, 8))

    def kernel(p_ref, t_ref, oi_ref, op_ref, ot_ref, i_acc, p_acc, t_acc):
        sp = pl.program_id(1)
        k = pl.program_id(2)
        gi = sp * num_k + k                    # global spatial-chunk index

        @pl.when(k == 0)
        def _():
            i_acc[...] = jnp.zeros_like(i_acc)
            p_acc[...] = jnp.zeros_like(p_acc)
            t_acc[...] = jnp.zeros_like(t_acc)

        zero = jnp.zeros((tm, 128), jnp.float32)

        def accumulate(carry):
            ci, cp, ct = carry
            # Single VMEM read-modify-write per grid step (sums carried in vregs).
            i_acc[...] += ci
            p_acc[...] += cp
            t_acc[...] += ct

        def full_body(j, carry):
            ci, cp, ct = carry
            off = pl.multiple_of(j * 128, 128)
            ps = p_ref[:, pl.ds(off, 128)].astype(jnp.float32)
            ts = t_ref[:, pl.ds(off, 128)].astype(jnp.float32)
            return ci + ps * ts, cp + ps * ps, ct + ts * ts

        def run_full():
            accumulate(jax.lax.fori_loop(0, n_sub, full_body,
                                         (zero, zero, zero), unroll=unroll))

        def run_masked():
            # Only the (at most one) ragged / padding chunk takes this path.
            col = gi * tk + jax.lax.broadcasted_iota(jnp.int32, (tm, 128), 1)

            def body(j, carry):
                ci, cp, ct = carry
                off = pl.multiple_of(j * 128, 128)
                valid = (col + off) < s_total
                ps = jnp.where(valid,
                               p_ref[:, pl.ds(off, 128)].astype(jnp.float32), 0.0)
                ts = jnp.where(valid,
                               t_ref[:, pl.ds(off, 128)].astype(jnp.float32), 0.0)
                return ci + ps * ts, cp + ps * ps, ct + ts * ts

            accumulate(jax.lax.fori_loop(0, n_sub, body, (zero, zero, zero),
                                         unroll=max(1, min(n_sub, 4))))

        if emit_full and emit_masked:
            pl.when(gi < n_full_chunks)(run_full)
            pl.when(gi >= n_full_chunks)(run_masked)
        elif emit_full:
            run_full()
        else:
            run_masked()

        @pl.when(k == num_k - 1)
        def _():
            # One cross-lane reduction per (row block, split): off the critical path.
            oi_ref[...] = jnp.sum(i_acc[...], axis=1, keepdims=True)[None]
            op_ref[...] = jnp.sum(p_acc[...], axis=1, keepdims=True)[None]
            ot_ref[...] = jnp.sum(t_acc[...], axis=1, keepdims=True)[None]

    return kernel


def dice_loss(pred, target, *, max_block_bytes=None):
    """Replicates DiceLoss.forward for 5-D NCDHW pred/target."""
    assert pred.shape == target.shape
    N, C = pred.shape[0], pred.shape[1]
    S = 1
    for d in pred.shape[2:]:
        S *= d
    NC = N * C

    # Free views: no wrapper-side padding or dtype upcast (the kernel upcasts
    # to f32 internally), so HBM traffic is exactly one read of each input.
    p2d = pred.reshape(NC, S)
    t2d = target.reshape(NC, S)

    itemsize = jnp.dtype(p2d.dtype).itemsize
    (tm, tk, num_r, n_split, num_k,
     n_chunks, n_full_chunks, vmem_limit) = _plan(NC, S, itemsize, max_block_bytes)

    total_chunks = n_split * num_k
    emit_full = n_full_chunks > 0
    emit_masked = total_chunks > n_full_chunks

    last_chunk = n_chunks - 1
    if total_chunks > n_chunks:
        # Padding chunks from the parallel spatial split re-read the last real
        # block (in-bounds DMA); the kernel's column mask zeroes them out.
        def in_map(r, sp, k):
            return (r, jnp.minimum(sp * num_k + k, last_chunk))
    else:
        def in_map(r, sp, k):
            return (r, sp * num_k + k)

    kernel = _make_dice_kernel(S, tm, tk, num_k, n_full_chunks,
                               emit_full, emit_masked)

    out_sds = jax.ShapeDtypeStruct((n_split, NC, 1), jnp.float32)
    out_spec = pl.BlockSpec((1, tm, 1), lambda r, sp, k: (sp, r, 0))

    inter_p, p2_p, t2_p = pl.pallas_call(
        kernel,
        out_shape=(out_sds, out_sds, out_sds),
        grid_spec=pltpu.PrefetchScalarGridSpec(
            num_scalar_prefetch=0,
            grid=(num_r, n_split, num_k),
            in_specs=[
                pl.BlockSpec((tm, tk), in_map),
                pl.BlockSpec((tm, tk), in_map),
            ],
            out_specs=[out_spec, out_spec, out_spec],
            scratch_shapes=[
                pltpu.VMEM((tm, 128), jnp.float32),
                pltpu.VMEM((tm, 128), jnp.float32),
                pltpu.VMEM((tm, 128), jnp.float32),
            ],
        ),
        compiler_params=pltpu.CompilerParams(
            dimension_semantics=("parallel", "parallel", "arbitrary"),
            vmem_limit_bytes=vmem_limit,
        ),
    )(p2d, t2d)

    # Tiny O(N*C) glue (matches the PyTorch loop + clamp exactly):
    #   dice[n,c] = 2*I/(P2+T2+1); dice[n] = sum_c/C; loss = clamp(mean_n(1-dice), 0, 1)
    inter = jnp.sum(inter_p[:, :, 0], axis=0)
    p2 = jnp.sum(p2_p[:, :, 0], axis=0)
    t2 = jnp.sum(t2_p[:, :, 0], axis=0)
    dice_nc = (2.0 * inter / (p2 + t2 + 1.0)).reshape(N, C)
    dice_n = jnp.sum(dice_nc, axis=1) / C
    return jnp.clip(jnp.mean(1.0 - dice_n), 0.0, 1.0)


def _reference_dice_loss(pred, target):
    """Pure-JAX reference mirroring the PyTorch module, for sanity check."""
    smooth = 1.0
    C = pred.shape[1]
    dice = 0.0
    for i in range(C):
        p = pred[:, i].astype(jnp.float32)
        t = target[:, i].astype(jnp.float32)
        inter = (p * t).sum(axis=(1, 2, 3))
        denom = (p ** 2).sum(axis=(1, 2, 3)) + (t ** 2).sum(axis=(1, 2, 3)) + smooth
        dice = dice + 2.0 * inter / denom
    dice = dice / C
    return jnp.clip(jnp.mean(1.0 - dice), 0.0, 1.0)


if __name__ == "__main__":
    key = jax.random.PRNGKey(0)
    k1, k2, k3, k4 = jax.random.split(key, 4)

    # Case 1: small 5-D NCDHW inputs (single fat block, fast unmasked path).
    N, C, D, H, W = 2, 4, 4, 8, 8
    pred = jax.nn.sigmoid(jax.random.normal(k1, (N, C, D, H, W), jnp.float32))
    target = (jax.random.uniform(k2, (N, C, D, H, W)) > 0.5).astype(jnp.float32)
    loss = jax.block_until_ready(dice_loss(pred, target))
    ref = jax.block_until_ready(_reference_dice_loss(pred, target))
    assert jnp.allclose(loss, ref, atol=1e-5, rtol=1e-5), (loss, ref)

    # Case 2: ragged spatial size with forced-small blocks so the parallel
    # spatial split, the masked tail path and the padding-chunk clamp are all
    # exercised (NC=6 is also not a sublane multiple).
    N, C, D, H, W = 2, 3, 4, 25, 21
    pred = jax.nn.sigmoid(jax.random.normal(k3, (N, C, D, H, W), jnp.float32))
    target = (jax.random.uniform(k4, (N, C, D, H, W)) > 0.5).astype(jnp.float32)
    loss2 = jax.block_until_ready(dice_loss(pred, target, max_block_bytes=4096))
    ref2 = jax.block_until_ready(_reference_dice_loss(pred, target))
    assert jnp.allclose(loss2, ref2, atol=1e-5, rtol=1e-5), (loss2, ref2)

    print("KERNEL_OK")
</pallas_src>

<mosaic_0001>
module attributes {stable_mosaic.version = 11 : i64} {
  func.func @kernel(%arg0: i32, %arg1: i32, %arg2: i32, %arg3: memref<8x256xf32, #tpu.memory_space<vmem>>, %arg4: memref<8x256xf32, #tpu.memory_space<vmem>>, %arg5: memref<1x8x1xf32, #tpu.memory_space<vmem>>, %arg6: memref<1x8x1xf32, #tpu.memory_space<vmem>>, %arg7: memref<1x8x1xf32, #tpu.memory_space<vmem>>, %arg8: memref<8x128xf32, #tpu.memory_space<vmem>>, %arg9: memref<8x128xf32, #tpu.memory_space<vmem>>, %arg10: memref<8x128xf32, #tpu.memory_space<vmem>>) attributes {dimension_semantics = [#tpu.dimension_semantics<parallel>, #tpu.dimension_semantics<parallel>, #tpu.dimension_semantics<arbitrary>], iteration_bounds = array<i64: 1, 1, 1>, scalar_prefetch = 0 : i64, scratch_operands = 3 : i64, tpu.core_type = #tpu.core_type<tc>, window_params = [{transform_indices = @transform_0, window_bounds = array<i64: 8, 256>}, {transform_indices = @transform_1, window_bounds = array<i64: 8, 256>}, {transform_indices = @transform_2, window_bounds = array<i64: 1, 8, 1>}, {transform_indices = @transform_3, window_bounds = array<i64: 1, 8, 1>}, {transform_indices = @transform_4, window_bounds = array<i64: 1, 8, 1>}]} {
    %c0_i32 = arith.constant 0 : i32
    %0 = arith.cmpi eq, %arg2, %c0_i32 : i32
    %1 = arith.extui %0 : i1 to i32
    %c0_i32_0 = arith.constant 0 : i32
    %2 = arith.cmpi ne, %1, %c0_i32_0 : i32
    scf.if %2 {
      %cst_20 = arith.constant 0.000000e+00 : f32
      %40 = vector.broadcast %cst_20 : f32 to vector<8x128xf32>
      %c0_21 = arith.constant 0 : index
      %c0_22 = arith.constant 0 : index
      %41 = vector.load %arg8[%c0_21, %c0_22] : memref<8x128xf32, #tpu.memory_space<vmem>>, vector<8x128xf32>
      tpu.vector_store %arg8[%c0_21, %c0_22], %40 {strides = array<i32>} : memref<8x128xf32, #tpu.memory_space<vmem>>, vector<8x128xf32>,
      %cst_23 = arith.constant 0.000000e+00 : f32
      %42 = vector.broadcast %cst_23 : f32 to vector<8x128xf32>
      %c0_24 = arith.constant 0 : index
      %c0_25 = arith.constant 0 : index
      %43 = vector.load %arg9[%c0_24, %c0_25] : memref<8x128xf32, #tpu.memory_space<vmem>>, vector<8x128xf32>
      tpu.vector_store %arg9[%c0_24, %c0_25], %42 {strides = array<i32>} : memref<8x128xf32, #tpu.memory_space<vmem>>, vector<8x128xf32>,
      %cst_26 = arith.constant 0.000000e+00 : f32
      %44 = vector.broadcast %cst_26 : f32 to vector<8x128xf32>
      %c0_27 = arith.constant 0 : index
      %c0_28 = arith.constant 0 : index
      %45 = vector.load %arg10[%c0_27, %c0_28] : memref<8x128xf32, #tpu.memory_space<vmem>>, vector<8x128xf32>
      tpu.vector_store %arg10[%c0_27, %c0_28], %44 {strides = array<i32>} : memref<8x128xf32, #tpu.memory_space<vmem>>, vector<8x128xf32>,
    } else {
    }
    %cst = arith.constant 0.000000e+00 : f32
    %3 = vector.broadcast %cst : f32 to vector<8x128xf32>
    %c0_i32_1 = arith.constant 0 : i32
    %c128_i32 = arith.constant 128 : i32
    %4 = arith.muli %c0_i32_1, %c128_i32 : i32
    %5 = tpu.assume_multiple %4, 128 : i32
    %c0 = arith.constant 0 : index
    %6 = arith.index_cast %5 : i32 to index
    %7 = vector.load %arg3[%c0, %6] : memref<8x256xf32, #tpu.memory_space<vmem>>, vector<8x128xf32>
    %c0_2 = arith.constant 0 : index
    %8 = arith.index_cast %5 : i32 to index
    %9 = vector.load %arg4[%c0_2, %8] : memref<8x256xf32, #tpu.memory_space<vmem>>, vector<8x128xf32>
    %10 = arith.mulf %7, %9 : vector<8x128xf32>
    %11 = arith.addf %3, %10 : vector<8x128xf32>
    %12 = arith.mulf %7, %7 : vector<8x128xf32>
    %13 = arith.addf %3, %12 : vector<8x128xf32>
    %14 = arith.mulf %9, %9 : vector<8x128xf32>
    %15 = arith.addf %3, %14 : vector<8x128xf32>
    %c1_i32 = arith.constant 1 : i32
    %c128_i32_3 = arith.constant 128 : i32
    %16 = arith.muli %c1_i32, %c128_i32_3 : i32
    %17 = tpu.assume_multiple %16, 128 : i32
    %c0_4 = arith.constant 0 : index
    %18 = arith.index_cast %17 : i32 to index
    %19 = vector.load %arg3[%c0_4, %18] : memref<8x256xf32, #tpu.memory_space<vmem>>, vector<8x128xf32>
    %c0_5 = arith.constant 0 : index
    %20 = arith.index_cast %17 : i32 to index
    %21 = vector.load %arg4[%c0_5, %20] : memref<8x256xf32, #tpu.memory_space<vmem>>, vector<8x128xf32>
    %22 = arith.mulf %19, %21 : vector<8x128xf32>
    %23 = arith.addf %11, %22 : vector<8x128xf32>
    %24 = arith.mulf %19, %19 : vector<8x128xf32>
    %25 = arith.addf %13, %24 : vector<8x128xf32>
    %26 = arith.mulf %21, %21 : vector<8x128xf32>
    %27 = arith.addf %15, %26 : vector<8x128xf32>
    %c2_i32 = arith.constant 2 : i32
    %c0_6 = arith.constant 0 : index
    %c0_7 = arith.constant 0 : index
    %28 = vector.load %arg8[%c0_6, %c0_7] : memref<8x128xf32, #tpu.memory_space<vmem>>, vector<8x128xf32>
    %29 = arith.addf %28, %23 : vector<8x128xf32>
    %c0_8 = arith.constant 0 : index
    %c0_9 = arith.constant 0 : index
    %30 = vector.load %arg8[%c0_8, %c0_9] : memref<8x128xf32, #tpu.memory_space<vmem>>, vector<8x128xf32>
    tpu.vector_store %arg8[%c0_8, %c0_9], %29 {strides = array<i32>} : memref<8x128xf32, #tpu.memory_space<vmem>>, vector<8x128xf32>,
    %c0_10 = arith.constant 0 : index
    %c0_11 = arith.constant 0 : index
    %31 = vector.load %arg9[%c0_10, %c0_11] : memref<8x128xf32, #tpu.memory_space<vmem>>, vector<8x128xf32>
    %32 = arith.addf %31, %25 : vector<8x128xf32>
    %c0_12 = arith.constant 0 : index
    %c0_13 = arith.constant 0 : index
    %33 = vector.load %arg9[%c0_12, %c0_13] : memref<8x128xf32, #tpu.memory_space<vmem>>, vector<8x128xf32>
    tpu.vector_store %arg9[%c0_12, %c0_13], %32 {strides = array<i32>} : memref<8x128xf32, #tpu.memory_space<vmem>>, vector<8x128xf32>,
    %c0_14 = arith.constant 0 : index
    %c0_15 = arith.constant 0 : index
    %34 = vector.load %arg10[%c0_14, %c0_15] : memref<8x128xf32, #tpu.memory_space<vmem>>, vector<8x128xf32>
    %35 = arith.addf %34, %27 : vector<8x128xf32>
    %c0_16 = arith.constant 0 : index
    %c0_17 = arith.constant 0 : index
    %36 = vector.load %arg10[%c0_16, %c0_17] : memref<8x128xf32, #tpu.memory_space<vmem>>, vector<8x128xf32>
    tpu.vector_store %arg10[%c0_16, %c0_17], %35 {strides = array<i32>} : memref<8x128xf32, #tpu.memory_space<vmem>>, vector<8x128xf32>,
    %c0_i32_18 = arith.constant 0 : i32
    %37 = arith.cmpi eq, %arg2, %c0_i32_18 : i32
    %38 = arith.extui %37 : i1 to i32
    %c0_i32_19 = arith.constant 0 : i32
    %39 = arith.cmpi ne, %38, %c0_i32_19 : i32
    scf.if %39 {
      %c0_20 = arith.constant 0 : index
      %c0_21 = arith.constant 0 : index
      %40 = vector.load %arg8[%c0_20, %c0_21] : memref<8x128xf32, #tpu.memory_space<vmem>>, vector<8x128xf32>
      %cst_22 = arith.constant dense<0.000000e+00> : vector<8xf32>
      %41 = vector.multi_reduction <add>, %40, %cst_22 [1] : vector<8x128xf32> to vector<8xf32>
      %42 = vector.shape_cast %41 : vector<8xf32> to vector<8x1xf32>
      %43 = vector.shape_cast %42 : vector<8x1xf32> to vector<1x8x1xf32>
      %c0_23 = arith.constant 0 : index
      %c0_24 = arith.constant 0 : index
      %c0_25 = arith.constant 0 : index
      %44 = vector.load %arg5[%c0_23, %c0_24, %c0_25] : memref<1x8x1xf32, #tpu.memory_space<vmem>>, vector<1x8x1xf32>
      tpu.vector_store %arg5[%c0_23, %c0_24, %c0_25], %43 {strides = array<i32>} : memref<1x8x1xf32, #tpu.memory_space<vmem>>, vector<1x8x1xf32>,
      %c0_26 = arith.constant 0 : index
      %c0_27 = arith.constant 0 : index
      %45 = vector.load %arg9[%c0_26, %c0_27] : memref<8x128xf32, #tpu.memory_space<vmem>>, vector<8x128xf32>
      %cst_28 = arith.constant dense<0.000000e+00> : vector<8xf32>
      %46 = vector.multi_reduction <add>, %45, %cst_28 [1] : vector<8x128xf32> to vector<8xf32>
      %47 = vector.shape_cast %46 : vector<8xf32> to vector<8x1xf32>
      %48 = vector.shape_cast %47 : vector<8x1xf32> to vector<1x8x1xf32>
      %c0_29 = arith.constant 0 : index
      %c0_30 = arith.constant 0 : index
      %c0_31 = arith.constant 0 : index
      %49 = vector.load %arg6[%c0_29, %c0_30, %c0_31] : memref<1x8x1xf32, #tpu.memory_space<vmem>>, vector<1x8x1xf32>
      tpu.vector_store %arg6[%c0_29, %c0_30, %c0_31], %48 {strides = array<i32>} : memref<1x8x1xf32, #tpu.memory_space<vmem>>, vector<1x8x1xf32>,
      %c0_32 = arith.constant 0 : index
      %c0_33 = arith.constant 0 : index
      %50 = vector.load %arg10[%c0_32, %c0_33] : memref<8x128xf32, #tpu.memory_space<vmem>>, vector<8x128xf32>
      %cst_34 = arith.constant dense<0.000000e+00> : vector<8xf32>
      %51 = vector.multi_reduction <add>, %50, %cst_34 [1] : vector<8x128xf32> to vector<8xf32>
      %52 = vector.shape_cast %51 : vector<8xf32> to vector<8x1xf32>
      %53 = vector.shape_cast %52 : vector<8x1xf32> to vector<1x8x1xf32>
      %c0_35 = arith.constant 0 : index
      %c0_36 = arith.constant 0 : index
      %c0_37 = arith.constant 0 : index
      %54 = vector.load %arg7[%c0_35, %c0_36, %c0_37] : memref<1x8x1xf32, #tpu.memory_space<vmem>>, vector<1x8x1xf32>
      tpu.vector_store %arg7[%c0_35, %c0_36, %c0_37], %53 {strides = array<i32>} : memref<1x8x1xf32, #tpu.memory_space<vmem>>, vector<1x8x1xf32>,
    } else {
    }
    return
  }
  func.func @transform_0(%arg0: i32, %arg1: i32, %arg2: i32) -> (i32, i32) {
    %c1_i32 = arith.constant 1 : i32
    %0 = arith.muli %arg1, %c1_i32 : i32
    %1 = arith.addi %0, %arg2 : i32
    %c0_i32 = arith.constant 0 : i32
    return %arg0, %1 : i32, i32
  }
  func.func @transform_1(%arg0: i32, %arg1: i32, %arg2: i32) -> (i32, i32) {
    %c1_i32 = arith.constant 1 : i32
    %0 = arith.muli %arg1, %c1_i32 : i32
    %1 = arith.addi %0, %arg2 : i32
    %c0_i32 = arith.constant 0 : i32
    return %arg0, %1 : i32, i32
  }
  func.func @transform_2(%arg0: i32, %arg1: i32, %arg2: i32) -> (i32, i32, i32) {
    %c0_i32 = arith.constant 0 : i32
    %c0_i32_0 = arith.constant 0 : i32
    return %arg1, %arg0, %c0_i32 : i32, i32, i32
  }
  func.func @transform_3(%arg0: i32, %arg1: i32, %arg2: i32) -> (i32, i32, i32) {
    %c0_i32 = arith.constant 0 : i32
    %c0_i32_0 = arith.constant 0 : i32
    return %arg1, %arg0, %c0_i32 : i32, i32, i32
  }
  func.func @transform_4(%arg0: i32, %arg1: i32, %arg2: i32) -> (i32, i32, i32) {
    %c0_i32 = arith.constant 0 : i32
    %c0_i32_0 = arith.constant 0 : i32
    return %arg1, %arg0, %c0_i32 : i32, i32, i32
  }
}

</mosaic_0001>

<bundles_post_ra>
// kernel: tpu_custom_call.1
= control target key start
LH: loop header
LB: loop body
LE: loop exit
PB: predicated region body
PF: predicated region fallthrough
CT: control target
= control target key end

     0   :  { %10 = vsyncpa [#allocation6], 0  ;;  %s224_s0 = inlined_call_operand.hbm [shape: f32[8,256], index: 0, kind: input, shape index: {}]   ;;  %s225_s1 = inlined_call_operand.hbm [shape: f32[8,256], index: 1, kind: input, shape index: {}]   ;;  %s226_s2 = inlined_call_operand.vmem [shape: f32[1,8,1], index: 2, kind: output, shape index: {0}]   ;;  %s227_s3 = inlined_call_operand.vmem [shape: f32[1,8,1], index: 3, kind: output, shape index: {1}]   ;;  %s228_s4 = inlined_call_operand.vmem [shape: f32[1,8,1], index: 4, kind: output, shape index: {2}]  }
   0x1   :  { %11 = vsyncpa [#allocation8], 0  ;;  %s164_s15 = smov [#allocation5]   ;;  %s165_s17 = smov [#allocation7]  }
   0x2   :  { %s22_s16 = sshll.u32 %s164_s15, 4  ;;  %s36_s18 = sshll.u32 %s165_s17, 4  ;;  %s23_s16 = int_to_ptr.vmem [resolvable:$true] %s22_s16  ;;  %s37_s18 = int_to_ptr.vmem [resolvable:$true] %s36_s18 }
   0x3   :  { %s116_s21 = scalar_lea.hbm %s224_s0, 256 }
   0x4   :  { %p117_p0 = scmp.ne.s32.totalorder %s224_s0, %s116_s21  ;;  %p120_p1 = scmp.lt.u32.totalorder %s116_s21, %s224_s0 }
   0x6   :  { %p122_p2 = pnand %p120_p1, %p117_p0 }
   0x8   :  { %125 = shalt.err (!%p122_p2)
}
   0x9   :  { %s126_s26 = scalar_lea.vmem %s23_s16, 256  ;;  %p131_p4 = scmp.lt.s32.totalorder %s23_s16, %s23_s16 }
   0xa   :  { %p127_p3 = scmp.ne.s32.totalorder %s23_s16, %s126_s26  ;;  %p132_p5 = scmp.lt.s32.totalorder %s126_s26, %s126_s26 }
   0xc   :  { %p133_p6 = por %p132_p5, %p131_p4 }
   0xe   :  { %p134_p7 = pnand %p133_p6, %p127_p3 }
  0x10   :  { %137 = shalt.err (!%p134_p7)
}
  0x11   :  { %25 = dma.hbm_to_vmem [thread:$0]  %s224_s0, 256, %s23_s16, [#allocation6]  }
  0x12   :  { %s138_s5 = scalar_lea.hbm %s225_s1, 256 }
  0x13   :  { %p139_p8 = scmp.ne.s32.totalorder %s225_s1, %s138_s5  ;;  %p142_p9 = scmp.lt.u32.totalorder %s138_s5, %s225_s1 }
  0x15   :  { %p144_p10 = pnand %p142_p9, %p139_p8 }
  0x17   :  { %147 = shalt.err (!%p144_p10)
}
  0x18   :  { %s148_s10 = scalar_lea.vmem %s37_s18, 256  ;;  %p153_p12 = scmp.lt.s32.totalorder %s37_s18, %s37_s18 }
  0x19   :  { %p149_p11 = scmp.ne.s32.totalorder %s37_s18, %s148_s10  ;;  %p154_p13 = scmp.lt.s32.totalorder %s148_s10, %s148_s10 }
  0x1b   :  { %p155_p0 = por %p154_p13, %p153_p12 }
  0x1d   :  { %p156_p1 = pnand %p155_p0, %p149_p11 }
  0x1f   :  { %159 = shalt.err (!%p156_p1)
}
  0x20   :  { %39 = dma.hbm_to_vmem [thread:$0]  %s225_s1, 256, %s37_s18, [#allocation8]  }
  0x21   :  { %160 = dma.done.wait [#allocation6], 256  }
  0x22   :  { %161 = vsyncadd [#allocation6], 4294967040 }
  0x23   :  { %162 = dma.done.wait [#allocation8], 256  }
  0x24   :  { %163 = vsyncadd [#allocation8], 4294967040  ;;  %v57_v0 = vld [vmem:[#allocation5] sm:$0xff]  ;;  %v58_v1 = vld [vmem:[#allocation7] sm:$0xff]  ;;  %vm90_vm0 = vcmask 7168  }
  0x25   :  { %v66_v2 = vld [vmem:[#allocation5 + $0x8] sm:$0xff]  ;;  %v59_v3 = vmul.f32 %v58_v1, %v57_v0  ;;  %v68_v4 = vld [vmem:[#allocation7 + $0x8] sm:$0xff]  ;;  %v63_v5 = vmul.f32 %v58_v1, %v58_v1  ;;  %v61_v8 = vmul.f32 %v57_v0, %v57_v0 }
  0x26   :  { %v69_v6 = vmul.f32 %v68_v4, %v66_v2  ;;  %v73_v7 = vmul.f32 %v68_v4, %v68_v4  ;;  %v71_v9 = vmul.f32 %v66_v2, %v66_v2 }
  0x28   :  { %v70_v10 = vadd.f32 %v69_v6, %v59_v3  ;;  %v74_v11 = vadd.f32 %v73_v7, %v63_v5  ;;  %v72_v12 = vadd.f32 %v71_v9, %v61_v8 }
  0x2a   :  { %88 = vadd.xlane.f32.xlu0 %v70_v10  ;;  %97 = vadd.xlane.f32.xlu1 %v74_v11 }
  0x2e   :  { %93 = vadd.xlane.f32.xlu0 %v72_v12 }
  0xb7   :  { %v89_v13 = vpop.xlane.xlu0 %88  ;;  %v98_v14 = vpop.xlane.xlu1 %97 }
  0xb8   :  { %91 = vst.msk [vmem:[%s226_s2] sm:$0xff] %vm90_vm0, %v89_v13  ;;  %99 = vst.msk [vmem:[%s228_s4] sm:$0xff] %vm90_vm0, %v98_v14 }
  0xbb   :  { %v94_v15 = vpop.xlane.xlu0 %93 }
  0xbc   :  { %95 = vst.msk [vmem:[%s227_s3] sm:$0xff] %vm90_vm0, %v94_v15 }
  0xbd   :  { %112 = vsyncpa [#allocation6], 1 }
  0xbe   :  { %113 = vsyncpa [#allocation8], 1 }

</bundles_post_ra>
